<compile_context>
chip_gen: v5e
topology: v5e:2x2
jax: 0.10.0
libtpu: 0.0.40
codegen_flags: <defaults>
</compile_context>

<pallas_src>
import jax
import jax.numpy as jnp
from jax.experimental import pallas as pl
from jax.experimental.pallas import tpu as pltpu


def _round_up(x, m):
    return ((x + m - 1) // m) * m


def _sublane_multiple(dtype):
    # Native sublane packing of the second-to-last dim by element width.
    itemsize = jnp.dtype(dtype).itemsize
    return {4: 8, 2: 16, 1: 32}.get(itemsize, 8)


def _dice_partial_kernel(logits_ref, labels_ref, inter_ref, s1_ref, s2_ref):
    s = pl.program_id(1)

    @pl.when(s == 0)
    def _init():
        inter_ref[...] = jnp.zeros_like(inter_ref)
        s1_ref[...] = jnp.zeros_like(s1_ref)
        s2_ref[...] = jnp.zeros_like(s2_ref)

    # Blocks are (TR, tS); cast to f32 only here (inputs stream narrow).
    probs = jax.nn.sigmoid(logits_ref[...].astype(jnp.float32))
    lab = labels_ref[...].astype(jnp.float32)

    inter_ref[...] += jnp.sum(probs * lab, axis=1, keepdims=True)
    s1_ref[...] += jnp.sum(probs, axis=1, keepdims=True)
    s2_ref[...] += jnp.sum(lab, axis=1, keepdims=True)
    # TODO(synk): if a bundle dump ever shows the XLU lane-reduce binding
    # instead of HBM, these three reductions can be fused into one MXU matmul
    # against a ones vector.


def _dice_partial_sums(logits2, labels2, tr, ts):
    r_pad, s_pad = logits2.shape
    grid = (r_pad // tr, s_pad // ts)
    out_shape = jax.ShapeDtypeStruct((r_pad, 1), jnp.float32)
    out_spec = pl.BlockSpec((tr, 1), lambda r, s: (r, 0))
    return pl.pallas_call(
        _dice_partial_kernel,
        out_shape=(out_shape, out_shape, out_shape),
        grid_spec=pltpu.PrefetchScalarGridSpec(
            num_scalar_prefetch=0,
            grid=grid,
            in_specs=[
                pl.BlockSpec((tr, ts), lambda r, s: (r, s)),
                pl.BlockSpec((tr, ts), lambda r, s: (r, s)),
            ],
            out_specs=[out_spec, out_spec, out_spec],
        ),
        compiler_params=pltpu.CompilerParams(
            dimension_semantics=("parallel", "arbitrary"),
            vmem_limit_bytes=32 * 1024 * 1024,
        ),
    )(logits2, labels2)


def soft_dice_loss(logits, labels, weights=None, *, smooth=1.0):
    """SoftDiceLoss forward.

    logits, labels: (B, C, *spatial). weights: (C,) or (1, C).
    Labels may be bool/int8/bf16/f32; they are cast to f32 inside the kernel.
    Returns a scalar f32 loss.
    """
    B, C = logits.shape[0], logits.shape[1]
    S = 1
    for d in logits.shape[2:]:
        S *= d
    R = B * C

    logits2 = logits.reshape(R, S)
    labels2 = labels.reshape(R, S)  # keep the narrow HBM dtype; cast in-kernel

    # --- tile selection ---------------------------------------------------
    row_mult = max(_sublane_multiple(logits2.dtype), _sublane_multiple(labels2.dtype))
    r_aligned = _round_up(R, row_mult)
    tr = r_aligned if r_aligned <= 512 else 512          # 512 is a multiple of 32
    r_pad = _round_up(R, tr)

    bytes_per_col = tr * (logits2.dtype.itemsize + labels2.dtype.itemsize)
    vmem_budget = 6 * 1024 * 1024                        # per buffered input pair
    max_ts = max(128, (vmem_budget // (2 * bytes_per_col)) // 128 * 128)
    ts = min(_round_up(S, 128), max_ts)
    s_pad = _round_up(S, ts)

    # --- padding: sigmoid(pad_logit) == 0 and pad_label == 0 contribute 0 --
    if r_pad != R or s_pad != S:
        logits2 = jnp.pad(
            logits2, ((0, r_pad - R), (0, s_pad - S)), constant_values=-1e9
        )
        labels2 = jnp.pad(labels2, ((0, r_pad - R), (0, s_pad - S)))

    inter, s1, s2 = _dice_partial_sums(logits2, labels2, tr, ts)

    inter = inter[:R, 0].reshape(B, C)
    s1 = s1[:R, 0].reshape(B, C)
    s2 = s2[:R, 0].reshape(B, C)

    if weights is None:
        # (The PyTorch module would error on None; ones keeps semantics benign.)
        w = jnp.ones((1, C), dtype=jnp.float32)
    else:
        w = jnp.asarray(weights, dtype=jnp.float32).reshape(1, C)

    # Tiny (B, C)-sized combine done in plain JAX (free vs. the HBM stream).
    score = 2.0 * (inter * w + smooth) / (s1 * w + s2 * w + smooth)
    return 1.0 - jnp.sum(score) / B


def _reference(logits, labels, weights, smooth=1.0):
    # Pure-JAX reference mirroring the PyTorch forward.
    B, C = labels.shape[0], labels.shape[1]
    probs = jax.nn.sigmoid(logits.astype(jnp.float32))
    m1 = probs.reshape(B, C, -1)
    m2 = labels.astype(jnp.float32).reshape(B, C, -1)
    inter = (m1 * m2).sum(2)
    w = jnp.broadcast_to(jnp.asarray(weights, jnp.float32).reshape(1, C), (B, C))
    score = 2.0 * (inter * w + smooth) / (m1.sum(2) * w + m2.sum(2) * w + smooth)
    return 1.0 - score.sum() / B


if __name__ == "__main__":
    key = jax.random.PRNGKey(0)
    k1, k2, k3 = jax.random.split(key, 3)

    B, C, H, W = 2, 4, 16, 16
    logits = jax.random.normal(k1, (B, C, H, W), dtype=jnp.float32)
    # Keep labels narrow in HBM (int8 0/1 mask); the f32 cast happens in-kernel.
    labels = (jax.random.uniform(k2, (B, C, H, W)) > 0.5).astype(jnp.int8)
    weights = jax.random.uniform(k3, (1, C), dtype=jnp.float32) + 0.5

    loss = soft_dice_loss(logits, labels, weights)
    jax.block_until_ready(loss)

    ref = _reference(logits, labels, weights)
    assert jnp.allclose(loss, ref, atol=1e-5, rtol=1e-5), (loss, ref)

    print("KERNEL_OK")
</pallas_src>

<mosaic_0001>
module attributes {stable_mosaic.version = 11 : i64} {
  func.func @_dice_partial_kernel(%arg0: i32, %arg1: i32, %arg2: memref<32x256xf32, #tpu.memory_space<vmem>>, %arg3: memref<32x256xi8, #tpu.memory_space<vmem>>, %arg4: memref<32x1xf32, #tpu.memory_space<vmem>>, %arg5: memref<32x1xf32, #tpu.memory_space<vmem>>, %arg6: memref<32x1xf32, #tpu.memory_space<vmem>>) attributes {dimension_semantics = [#tpu.dimension_semantics<parallel>, #tpu.dimension_semantics<arbitrary>], iteration_bounds = array<i64: 1, 1>, scalar_prefetch = 0 : i64, scratch_operands = 0 : i64, tpu.core_type = #tpu.core_type<tc>, window_params = [{transform_indices = @transform_0, window_bounds = array<i64: 32, 256>}, {transform_indices = @transform_1, window_bounds = array<i64: 32, 256>}, {transform_indices = @transform_2, window_bounds = array<i64: 32, 1>}, {transform_indices = @transform_3, window_bounds = array<i64: 32, 1>}, {transform_indices = @transform_4, window_bounds = array<i64: 32, 1>}]} {
    %c0_i32 = arith.constant 0 : i32
    %0 = arith.cmpi eq, %arg1, %c0_i32 : i32
    %1 = arith.extui %0 : i1 to i32
    %c0_i32_0 = arith.constant 0 : i32
    %2 = arith.cmpi ne, %1, %c0_i32_0 : i32
    scf.if %2 {
      %cst_19 = arith.constant 0.000000e+00 : f32
      %27 = vector.broadcast %cst_19 : f32 to vector<32x1xf32>
      %c0_20 = arith.constant 0 : index
      %c0_21 = arith.constant 0 : index
      %28 = vector.load %arg4[%c0_20, %c0_21] : memref<32x1xf32, #tpu.memory_space<vmem>>, vector<32x1xf32>
      tpu.vector_store %arg4[%c0_20, %c0_21], %27 {strides = array<i32>} : memref<32x1xf32, #tpu.memory_space<vmem>>, vector<32x1xf32>,
      %cst_22 = arith.constant 0.000000e+00 : f32
      %29 = vector.broadcast %cst_22 : f32 to vector<32x1xf32>
      %c0_23 = arith.constant 0 : index
      %c0_24 = arith.constant 0 : index
      %30 = vector.load %arg5[%c0_23, %c0_24] : memref<32x1xf32, #tpu.memory_space<vmem>>, vector<32x1xf32>
      tpu.vector_store %arg5[%c0_23, %c0_24], %29 {strides = array<i32>} : memref<32x1xf32, #tpu.memory_space<vmem>>, vector<32x1xf32>,
      %cst_25 = arith.constant 0.000000e+00 : f32
      %31 = vector.broadcast %cst_25 : f32 to vector<32x1xf32>
      %c0_26 = arith.constant 0 : index
      %c0_27 = arith.constant 0 : index
      %32 = vector.load %arg6[%c0_26, %c0_27] : memref<32x1xf32, #tpu.memory_space<vmem>>, vector<32x1xf32>
      tpu.vector_store %arg6[%c0_26, %c0_27], %31 {strides = array<i32>} : memref<32x1xf32, #tpu.memory_space<vmem>>, vector<32x1xf32>,
    } else {
    }
    %c0 = arith.constant 0 : index
    %c0_1 = arith.constant 0 : index
    %3 = vector.load %arg2[%c0, %c0_1] : memref<32x256xf32, #tpu.memory_space<vmem>>, vector<32x256xf32>
    %4 = arith.negf %3 : vector<32x256xf32>
    %5 = math.exp %4 : vector<32x256xf32>
    %cst = arith.constant 1.000000e+00 : f32
    %6 = vector.broadcast %cst : f32 to vector<32x256xf32>
    %7 = arith.addf %6, %5 : vector<32x256xf32>
    %8 = arith.divf %6, %7 : vector<32x256xf32>
    %c0_2 = arith.constant 0 : index
    %c0_3 = arith.constant 0 : index
    %9 = vector.load %arg3[%c0_2, %c0_3] : memref<32x256xi8, #tpu.memory_space<vmem>>, vector<32x256xi8>
    %10 = arith.sitofp %9 : vector<32x256xi8> to vector<32x256xf32>
    %c0_4 = arith.constant 0 : index
    %c0_5 = arith.constant 0 : index
    %11 = vector.load %arg4[%c0_4, %c0_5] : memref<32x1xf32, #tpu.memory_space<vmem>>, vector<32x1xf32>
    %12 = arith.mulf %8, %10 : vector<32x256xf32>
    %cst_6 = arith.constant dense<0.000000e+00> : vector<32xf32>
    %13 = vector.multi_reduction <add>, %12, %cst_6 [1] : vector<32x256xf32> to vector<32xf32>
    %14 = vector.shape_cast %13 : vector<32xf32> to vector<32x1xf32>
    %15 = arith.addf %11, %14 : vector<32x1xf32>
    %c0_7 = arith.constant 0 : index
    %c0_8 = arith.constant 0 : index
    %16 = vector.load %arg4[%c0_7, %c0_8] : memref<32x1xf32, #tpu.memory_space<vmem>>, vector<32x1xf32>
    tpu.vector_store %arg4[%c0_7, %c0_8], %15 {strides = array<i32>} : memref<32x1xf32, #tpu.memory_space<vmem>>, vector<32x1xf32>,
    %c0_9 = arith.constant 0 : index
    %c0_10 = arith.constant 0 : index
    %17 = vector.load %arg5[%c0_9, %c0_10] : memref<32x1xf32, #tpu.memory_space<vmem>>, vector<32x1xf32>
    %cst_11 = arith.constant dense<0.000000e+00> : vector<32xf32>
    %18 = vector.multi_reduction <add>, %8, %cst_11 [1] : vector<32x256xf32> to vector<32xf32>
    %19 = vector.shape_cast %18 : vector<32xf32> to vector<32x1xf32>
    %20 = arith.addf %17, %19 : vector<32x1xf32>
    %c0_12 = arith.constant 0 : index
    %c0_13 = arith.constant 0 : index
    %21 = vector.load %arg5[%c0_12, %c0_13] : memref<32x1xf32, #tpu.memory_space<vmem>>, vector<32x1xf32>
    tpu.vector_store %arg5[%c0_12, %c0_13], %20 {strides = array<i32>} : memref<32x1xf32, #tpu.memory_space<vmem>>, vector<32x1xf32>,
    %c0_14 = arith.constant 0 : index
    %c0_15 = arith.constant 0 : index
    %22 = vector.load %arg6[%c0_14, %c0_15] : memref<32x1xf32, #tpu.memory_space<vmem>>, vector<32x1xf32>
    %cst_16 = arith.constant dense<0.000000e+00> : vector<32xf32>
    %23 = vector.multi_reduction <add>, %10, %cst_16 [1] : vector<32x256xf32> to vector<32xf32>
    %24 = vector.shape_cast %23 : vector<32xf32> to vector<32x1xf32>
    %25 = arith.addf %22, %24 : vector<32x1xf32>
    %c0_17 = arith.constant 0 : index
    %c0_18 = arith.constant 0 : index
    %26 = vector.load %arg6[%c0_17, %c0_18] : memref<32x1xf32, #tpu.memory_space<vmem>>, vector<32x1xf32>
    tpu.vector_store %arg6[%c0_17, %c0_18], %25 {strides = array<i32>} : memref<32x1xf32, #tpu.memory_space<vmem>>, vector<32x1xf32>,
    return
  }
  func.func @transform_0(%arg0: i32, %arg1: i32) -> (i32, i32) {
    %c0_i32 = arith.constant 0 : i32
    return %arg0, %arg1 : i32, i32
  }
  func.func @transform_1(%arg0: i32, %arg1: i32) -> (i32, i32) {
    %c0_i32 = arith.constant 0 : i32
    return %arg0, %arg1 : i32, i32
  }
  func.func @transform_2(%arg0: i32, %arg1: i32) -> (i32, i32) {
    %c0_i32 = arith.constant 0 : i32
    %c0_i32_0 = arith.constant 0 : i32
    return %arg0, %c0_i32 : i32, i32
  }
  func.func @transform_3(%arg0: i32, %arg1: i32) -> (i32, i32) {
    %c0_i32 = arith.constant 0 : i32
    %c0_i32_0 = arith.constant 0 : i32
    return %arg0, %c0_i32 : i32, i32
  }
  func.func @transform_4(%arg0: i32, %arg1: i32) -> (i32, i32) {
    %c0_i32 = arith.constant 0 : i32
    %c0_i32_0 = arith.constant 0 : i32
    return %arg0, %c0_i32 : i32, i32
  }
}

</mosaic_0001>

<bundles_post_ra>
// kernel: tpu_custom_call.1
= control target key start
LH: loop header
LB: loop body
LE: loop exit
PB: predicated region body
PF: predicated region fallthrough
CT: control target
= control target key end

     0   :  { %10 = vsyncpa [#allocation3], 0  ;;  %s786_s0 = inlined_call_operand.hbm [shape: f32[32,256], index: 0, kind: input, shape index: {}]   ;;  %s787_s1 = inlined_call_operand.hbm [shape: s8[32,256], index: 1, kind: input, shape index: {}]   ;;  %s788_s2 = inlined_call_operand.vmem [shape: f32[32,1], index: 2, kind: output, shape index: {0}]   ;;  %s789_s3 = inlined_call_operand.vmem [shape: f32[32,1], index: 3, kind: output, shape index: {1}]   ;;  %s790_s4 = inlined_call_operand.vmem [shape: f32[32,1], index: 4, kind: output, shape index: {2}]  }
   0x1   :  { %s16_s17 = sshll.u32 %s786_s0, 4  ;;  %s17_s17 = int_to_ptr.hbm [resolvable:$true] %s16_s17 }
   0x2   :  { %11 = vsyncpa [#allocation5], 0  ;;  %s431_s18 = smov [#allocation2]   ;;  %s30_s22 = sshll.u32 %s787_s1, 4  ;;  %s31_s22 = int_to_ptr.hbm [resolvable:$true] %s30_s22 }
   0x3   :  { %s18_s19 = sshll.u32 %s431_s18, 4  ;;  %s432_s23 = smov 256   ;;  %s19_s19 = int_to_ptr.vmem [resolvable:$true] %s18_s19 }
   0x4   :  { %s433_s24 = smov 16   ;;  %s434_s25 = smov [#allocation4]  }
   0x5   :  { %24 = dma.hbm_to_vmem [thread:$0]  %s17_s17, 1024, %s19_s19, [#allocation3], %s432_s23, %s432_s23, %s433_s24  }
   0x6   :  { %s32_s26 = sshll.u32 %s434_s25, 4  ;;  %s33_s26 = int_to_ptr.vmem [resolvable:$true] %s32_s26 }
   0x7   :  { %35 = dma.hbm_to_vmem [thread:$0]  %s31_s22, 256, %s33_s26, [#allocation5]  }
   0x8   :  { %427 = dma.done.wait [#allocation3], 1024  }
   0x9   :  { %428 = vsyncadd [#allocation3], 4294966272 }
   0xa   :  { %429 = dma.done.wait [#allocation5], 256  }
   0xb   :  { %430 = vsyncadd [#allocation5], 4294967040  ;;  %v467_v0 = vld [vmem:[#allocation4] sm:$0xff]  ;;  %v469_v1 = vld [vmem:[#allocation4 + $0x8] sm:$0xff] }
   0xc   :  { %v67_v2 = vld [vmem:[#allocation2 + $0x30] sm:$0xff]  ;;  %v223_v3 = vunpack.c.0.s8 %v467_v0  ;;  %v224_v4 = vunpack.c.0.s8 %v469_v1  ;;  %v68_v5 = vld [vmem:[#allocation2 + $0x38] sm:$0xff]  ;;  %v65_v7 = vld [vmem:[#allocation2 + $0x20] sm:$0xff]  ;;  %v229_v20 = vunpack.c.3.s8 %v467_v0  ;;  %v230_v21 = vunpack.c.3.s8 %v469_v1 }
   0xd   :  { %v340_v6 = vmul.f32 -1.442695, %v67_v2  ;;  %v66_v8 = vld [vmem:[#allocation2 + $0x28] sm:$0xff]  ;;  %v341_v9 = vmul.f32 -1.442695, %v68_v5  ;;  %v61_v14 = vld [vmem:[#allocation2] sm:$0xff]  ;;  %v227_v24 = vunpack.c.2.s8 %v467_v0  ;;  %v228_v30 = vunpack.c.2.s8 %v469_v1 }
   0xe   :  { %v338_v10 = vmul.f32 -1.442695, %v65_v7  ;;  %v339_v11 = vmul.f32 -1.442695, %v66_v8  ;;  %v473_v12 = vcvt.s32.f32 %v223_v3  ;;  %v475_v13 = vcvt.s32.f32 %v224_v4  ;;  %v62_v15 = vld [vmem:[#allocation2 + $0x8] sm:$0xff]  ;;  %v63_v19 = vld [vmem:[#allocation2 + $0x10] sm:$0xff] }
   0xf   :  { %347 = vpow2.f32 %v340_v6  ;;  %v334_v17 = vmul.f32 -1.442695, %v61_v14  ;;  %v335_v18 = vmul.f32 -1.442695, %v62_v15  ;;  %v64_v22 = vld [vmem:[#allocation2 + $0x18] sm:$0xff]  ;;  %v488_v33 = vcvt.s32.f32 %v229_v20 }
  0x10   :  { %349 = vpow2.f32 %v341_v9  ;;  %v300_v16 = vadd.f32 %v475_v13, %v473_v12  ;;  %v336_v27 = vmul.f32 -1.442695, %v63_v19  ;;  %v337_v31 = vmul.f32 -1.442695, %v64_v22 }
  0x11   :  { %351 = vpow2.f32 %v338_v10  ;;  %v490_v34 = vcvt.s32.f32 %v230_v21  ;;  %v495_v38 = vcvt.s32.f32 %v227_v24  ;;  %v503_v44 = vcvt.s32.f32 %v228_v30 }
  0x12   :  { %353 = vpow2.f32 %v339_v11  ;;  %301 = vadd.xlane.f32.xlu2 %v300_v16  ;;  %v435_v21 = vmov 0.0  }
  0x13   :  { %355 = vpow2.f32 %v334_v17 }
  0x14   :  { %357 = vpow2.f32 %v335_v18  ;;  %v225_v18 = vunpack.c.1.s8 %v467_v0 }
  0x15   :  { %v348_v23 = vpop.eup %347 }
  0x16   :  { %v350_v25 = vpop.eup %349  ;;  %v482_v26 = vadd.f32 1.0, %v348_v23 }
  0x17   :  { %v352_v28 = vpop.eup %351  ;;  %v484_v29 = vadd.f32 1.0, %v350_v25 }
  0x18   :  { %v354_v32 = vpop.eup %353  ;;  %359 = vrcp.f32 %v482_v26  ;;  %v200_v36 = vand.u32 2147483647, %v482_v26  ;;  %v202_v37 = vand.u32 2147483648, %v482_v26  ;;  %v498_v41 = vadd.f32 1.0, %v352_v28 }
  0x19   :  { %v356_v35 = vpop.eup %355  ;;  %361 = vrcp.f32 %v484_v29  ;;  %v215_v40 = vand.u32 2147483647, %v484_v29  ;;  %v500_v42 = vadd.f32 1.0, %v354_v32  ;;  %v217_v43 = vand.u32 2147483648, %v484_v29 }
  0x1a   :  { %v358_v39 = vpop.eup %357  ;;  %363 = vpow2.f32 %v336_v27  ;;  %v505_v45 = vadd.f32 1.0, %v356_v35  ;;  %vm196_vm0 = vweird.f32 %v482_v26  ;;  %vm211_vm1 = vweird.f32 %v484_v29 }
  0x1b   :  { %365 = vpow2.f32 %v337_v31  ;;  %v172_v46 = vand.u32 2147483648, %v498_v41  ;;  %vm511_vm2 = vcmp.eq.f32.partialorder %v200_v36, 8.507059e+37  ;;  %v203_v48 = vor.u32 1.1754944e-38, %v202_v37 }
  0x1c   :  { %367 = vrcp.f32 %v498_v41  ;;  %v170_v49 = vand.u32 2147483647, %v498_v41  ;;  %v517_v50 = vadd.f32 1.0, %v358_v39  ;;  %vm519_vm3 = vcmp.eq.f32.partialorder %v215_v40, 8.507059e+37 }
  0x1d   :  { %369 = vrcp.f32 %v500_v42  ;;  %v185_v53 = vand.u32 2147483647, %v500_v42  ;;  %v187_v54 = vand.u32 2147483648, %v500_v42  ;;  %v218_v57 = vor.u32 1.1754944e-38, %v217_v43 }
  0x1e   :  { %v360_v51 = vpop.eup %359  ;;  %371 = vrcp.f32 %v505_v45  ;;  %vm166_vm4 = vweird.f32 %v498_v41  ;;  %vm181_vm5 = vweird.f32 %v500_v42  ;;  %v173_v60 = vor.u32 1.1754944e-38, %v172_v46 }
  0x1f   :  { %v362_v55 = vpop.eup %361  ;;  %v192_v56 = vmul.f32 %v360_v51, %v482_v26  ;;  %v110_v61 = vand.u32 2147483647, %v505_v45  ;;  %v112_v62 = vand.u32 2147483648, %v505_v45  ;;  %vm197_vm6 = vweird.f32 %v360_v51 }
  0x20   :  { %v364_v58 = vpop.eup %363  ;;  %v207_v59 = vmul.f32 %v362_v55, %v484_v29  ;;  %vm532_vm7 = vcmp.eq.f32.partialorder %v170_v49, 8.507059e+37  ;;  %vm106_vm8 = vweird.f32 %v505_v45  ;;  %373 = vrcp.f32 %v517_v50  ;;  %vm548_vm12 = vmor %vm196_vm0, %vm197_vm6 }
  0x21   :  { %v366_v63 = vpop.eup %365  ;;  %v193_v2 = vsub.f32 1.0, %v192_v56  ;;  %vm212_vm9 = vweird.f32 %v362_v55  ;;  %vm538_vm10 = vcmp.eq.f32.partialorder %v185_v53, 8.507059e+37  ;;  %v188_v7 = vor.u32 1.1754944e-38, %v187_v54 }
  0x22   :  { %v368_v4 = vpop.eup %367  ;;  %v208_v5 = vsub.f32 1.0, %v207_v59  ;;  %vm121_vm11 = vweird.f32 %v517_v50  ;;  %v125_v11 = vand.u32 2147483647, %v517_v50  ;;  %vm553_vm13 = vcmp.eq.f32.partialorder %v110_v61, 8.507059e+37  ;;  %vm560_vm14 = vmor %vm211_vm1, %vm212_vm9 }
  0x23   :  { %v370_v8 = vpop.eup %369  ;;  %v194_v9 = vmul.f32 %v360_v51, %v193_v2  ;;  %v162_v10 = vmul.f32 %v368_v4, %v498_v41  ;;  %v113_v19 = vor.u32 1.1754944e-38, %v112_v62  ;;  %vm167_vm15 = vweird.f32 %v368_v4 }
  0x24   :  { %v372_v14 = vpop.eup %371  ;;  %v209_v16 = vmul.f32 %v362_v55, %v208_v5  ;;  %v177_v17 = vmul.f32 %v370_v8, %v500_v42  ;;  %vm182_vm0 = vweird.f32 %v370_v8  ;;  %v567_v31 = vadd.f32 1.0, %v364_v58  ;;  %vm575_vm1 = vmor %vm166_vm4, %vm167_vm15 }
  0x25   :  { %v195_v20 = vadd.f32 %v360_v51, %v194_v9  ;;  %v163_v22 = vsub.f32 1.0, %v162_v10  ;;  %v102_v23 = vmul.f32 %v372_v14, %v505_v45  ;;  %vm107_vm6 = vweird.f32 %v372_v14  ;;  %vm584_vm9 = vmor %vm181_vm5, %vm182_vm0 }
  0x26   :  { %v210_v24 = vadd.f32 %v362_v55, %v209_v16  ;;  %v178_v25 = vsub.f32 1.0, %v177_v17  ;;  %v374_v26 = vpop.eup %373  ;;  %v127_v41 = vand.u32 2147483648, %v517_v50  ;;  %v596_v52 = vadd.f32 1.0, %v366_v63 }
  0x27   :  { %v199_v27 = vsel %vm548_vm12, %v360_v51, %v195_v20  ;;  %v164_v28 = vmul.f32 %v368_v4, %v163_v22  ;;  %v103_v30 = vsub.f32 1.0, %v102_v23  ;;  %v117_v37 = vmul.f32 %v374_v26, %v517_v50 }
  0x28   :  { %v204_v29 = vsel %vm511_vm2, %v203_v48, %v199_v27  ;;  %v214_v32 = vsel %vm560_vm14, %v362_v55, %v210_v24  ;;  %v179_v36 = vmul.f32 %v370_v8, %v178_v25  ;;  %vm592_vm2 = vmor %vm106_vm8, %vm107_vm6  ;;  %375 = vrcp.f32 %v567_v31 }
  0x29   :  { %v219_v39 = vsel %vm519_vm3, %v218_v57, %v214_v32  ;;  %v165_v40 = vadd.f32 %v368_v4, %v164_v28  ;;  %v104_v46 = vmul.f32 %v372_v14, %v103_v30  ;;  %v118_v51 = vsub.f32 1.0, %v117_v37 }
  0x2a   :  { %v285_v47 = vadd.f32 %v219_v39, %v204_v29  ;;  %v180_v48 = vadd.f32 %v370_v8, %v179_v36  ;;  %vm122_vm3 = vweird.f32 %v374_v26  ;;  %vm605_vm4 = vcmp.eq.f32.partialorder %v125_v11, 8.507059e+37 }
  0x2b   :  { %v169_v42 = vsel %vm575_vm1, %v368_v4, %v165_v40  ;;  %v105_v53 = vadd.f32 %v372_v14, %v104_v46  ;;  %v119_v55 = vmul.f32 %v374_v26, %v118_v51  ;;  %vm123_vm5 = vmor %vm121_vm11, %vm122_vm3  ;;  %377 = vrcp.f32 %v596_v52 }
  0x2c   :  { %286 = vadd.xlane.f32.xlu1 %v285_v47  ;;  %v174_v54 = vsel %vm532_vm7, %v173_v60, %v169_v42  ;;  %v184_v45 = vsel %vm584_vm9, %v370_v8, %v180_v48  ;;  %v128_v60 = vor.u32 1.1754944e-38, %v127_v41  ;;  %v250_v8 = vmul.f32 %v490_v34, %v219_v39 }
  0x2d   :  { %v189_v57 = vsel %vm538_vm10, %v188_v7, %v184_v45  ;;  %v247_v58 = vmul.f32 %v495_v38, %v174_v54  ;;  %v109_v59 = vsel %vm592_vm2, %v372_v14, %v105_v53  ;;  %v120_v2 = vadd.f32 %v374_v26, %v119_v55 }
  0x2e   :  { %v248_v61 = vmul.f32 %v503_v44, %v189_v57  ;;  %v282_v62 = vadd.f32 %v189_v57, %v174_v54  ;;  %v114_v63 = vsel %vm553_vm13, %v113_v19, %v109_v59  ;;  %v376_v6 = vpop.eup %375  ;;  %v249_v7 = vmul.f32 %v488_v33, %v204_v29 }
  0x2f   :  { %v124_v4 = vsel %vm123_vm5, %v374_v26, %v120_v2  ;;  %v243_v5 = vmul.f32 %v473_v12, %v114_v63  ;;  %v132_v11 = vmul.f32 %v376_v6, %v567_v31  ;;  %v140_v14 = vand.u32 2147483647, %v567_v31 }
  0x30   :  { %283 = vadd.xlane.f32.xlu0 %v282_v62  ;;  %v257_v3 = vadd.f32 %v248_v61, %v247_v58  ;;  %v129_v50 = vsel %vm605_vm4, %v128_v60, %v124_v4  ;;  %v142_v15 = vand.u32 2147483648, %v567_v31  ;;  %vm136_vm7 = vweird.f32 %v567_v31 }
  0x31   :  { %v276_v9 = vadd.f32 %v129_v50, %v114_v63  ;;  %v244_v10 = vmul.f32 %v475_v13, %v129_v50  ;;  %v133_v16 = vsub.f32 1.0, %v132_v11  ;;  %vm137_vm8 = vweird.f32 %v376_v6  ;;  %v378_v17 = vpop.eup %377 }
  0x32   :  { %vm48_vm10 = vcmask 7168   ;;  %v260_v19 = vadd.f32 %v250_v8, %v249_v7  ;;  %v147_v13 = vmul.f32 %v378_v17, %v596_v52  ;;  %vm151_vm11 = vweird.f32 %v596_v52  ;;  %vm637_vm12 = vmor %vm136_vm7, %vm137_vm8 }
  0x33   :  { %277 = vadd.xlane.f32.xlu2 %v276_v9  ;;  %v251_v12 = vadd.f32 %v244_v10, %v243_v5  ;;  %v134_v20 = vmul.f32 %v376_v6, %v133_v16  ;;  %57 = vst.msk [vmem:[%s790_s4] sm:$0xff] %vm48_vm10, %v435_v21  ;;  %vm641_vm13 = vcmp.eq.f32.partialorder %v140_v14, 8.507059e+37  ;;  %v143_v0 = vor.u32 1.1754944e-38, %v142_v15 }
  0x34   :  { %258 = vadd.xlane.f32.xlu1 %v257_v3  ;;  %v155_v24 = vand.u32 2147483647, %v596_v52  ;;  %v157_v25 = vand.u32 2147483648, %v596_v52  ;;  %49 = vst.msk [vmem:[%s788_s2] sm:$0xff] %vm48_vm10, %v435_v21  ;;  %v148_v27 = vsub.f32 1.0, %v147_v13  ;;  %vm152_vm14 = vweird.f32 %v378_v17 }
  0x35   :  { %v135_v26 = vadd.f32 %v376_v6, %v134_v20  ;;  %v226_v28 = vunpack.c.1.s8 %v469_v1  ;;  %50 = vst.msk [vmem:[%s788_s2 + $0x8] sm:$0xff] %vm48_vm10, %v435_v21  ;;  %v233_v29 = vcvt.s32.f32 %v225_v18  ;;  %vm153_vm15 = vmor %vm151_vm11, %vm152_vm14  ;;  %v306_v41 = vadd.f32 %v503_v44, %v495_v38 }
  0x36   :  { %51 = vst.msk [vmem:[%s788_s2 + $0x10] sm:$0xff] %vm48_vm10, %v435_v21  ;;  %v149_v31 = vmul.f32 %v378_v17, %v148_v27  ;;  %v158_v32 = vor.u32 1.1754944e-38, %v157_v25  ;;  %vm156_vm0 = vcmp.eq.f32.partialorder %v155_v24, 8.507059e+37  ;;  %v309_v48 = vadd.f32 %v490_v34, %v488_v33 }
  0x37   :  { %v139_v30 = vsel %vm637_vm12, %v376_v6, %v135_v26  ;;  %52 = vst.msk [vmem:[%s788_s2 + $0x18] sm:$0xff] %vm48_vm10, %v435_v21  ;;  %v234_v36 = vcvt.s32.f32 %v226_v28 }
  0x38   :  { %252 = vadd.xlane.f32.xlu0 %v251_v12  ;;  %v144_v1 = vsel %vm641_vm13, %v143_v0, %v139_v30  ;;  %53 = vst.msk [vmem:[%s789_s3] sm:$0xff] %vm48_vm10, %v435_v21  ;;  %v150_v35 = vadd.f32 %v378_v17, %v149_v31 }
  0x39   :  { %54 = vst.msk [vmem:[%s789_s3 + $0x8] sm:$0xff] %vm48_vm10, %v435_v21  ;;  %v245_v39 = vmul.f32 %v233_v29, %v144_v1  ;;  %v303_v49 = vadd.f32 %v234_v36, %v233_v29 }
  0x3a   :  { %55 = vst.msk [vmem:[%s789_s3 + $0x10] sm:$0xff] %vm48_vm10, %v435_v21  ;;  %v154_v37 = vsel %vm153_vm15, %v378_v17, %v150_v35  ;;  %v296_v38 = vld [vmem:[%s790_s4] sm:$0xff] }
  0x3b   :  { %56 = vst.msk [vmem:[%s789_s3 + $0x18] sm:$0xff] %vm48_vm10, %v435_v21  ;;  %v159_v40 = vsel %vm156_vm0, %v158_v32, %v154_v37  ;;  %v239_v60 = vld [vmem:[%s788_s2] sm:$0xff] }
  0x3c   :  { %261 = vadd.xlane.f32.xlu1 %v260_v19  ;;  %58 = vst.msk [vmem:[%s790_s4 + $0x8] sm:$0xff] %vm48_vm10, %v435_v21  ;;  %v279_v43 = vadd.f32 %v159_v40, %v144_v1  ;;  %v246_v46 = vmul.f32 %v234_v36, %v159_v40  ;;  %v240_v6 = vld [vmem:[%s788_s2 + $0x8] sm:$0xff] }
  0x3d   :  { %59 = vst.msk [vmem:[%s790_s4 + $0x10] sm:$0xff] %vm48_vm10, %v435_v21  ;;  %v241_v45 = vld [vmem:[%s788_s2 + $0x10] sm:$0xff] }
  0x3e   :  { %60 = vst.msk [vmem:[%s790_s4 + $0x18] sm:$0xff] %vm48_vm10, %v435_v21  ;;  %280 = vadd.xlane.f32.xlu2 %v279_v43  ;;  %v254_v47 = vadd.f32 %v246_v46, %v245_v39  ;;  %v242_v63 = vld [vmem:[%s788_s2 + $0x18] sm:$0xff] }
  0x3f   :  { %v272_v55 = vld [vmem:[%s789_s3] sm:$0xff] }
  0x40   :  { %255 = vadd.xlane.f32.xlu0 %v254_v47  ;;  %v273_v4 = vld [vmem:[%s789_s3 + $0x8] sm:$0xff] }
  0x41   :  { %v274_v34 = vld [vmem:[%s789_s3 + $0x10] sm:$0xff] }
  0x42   :  { %v275_v52 = vld [vmem:[%s789_s3 + $0x18] sm:$0xff] }
  0x43   :  { %v297_v12 = vld [vmem:[%s790_s4 + $0x8] sm:$0xff] }
  0x44   :  { %307 = vadd.xlane.f32.xlu1 %v306_v41  ;;  %v298_v7 = vld [vmem:[%s790_s4 + $0x10] sm:$0xff] }
  0x45   :  { %v299_v14 = vld [vmem:[%s790_s4 + $0x18] sm:$0xff] }
  0x46   :  { %310 = vadd.xlane.f32.xlu2 %v309_v48 }
  0x48   :  { %304 = vadd.xlane.f32.xlu0 %v303_v49 }
  0x85   :  { %v302_v44 = vpop.xlane.xlu2 %301 }
  0x86   :  { %v312_v51 = vadd.f32 %v302_v44, %v296_v38 }
  0x88   :  { %316 = vst.msk [vmem:[%s790_s4] sm:$0xff] %vm48_vm10, %v312_v51 }
  0x9f   :  { %v287_v42 = vpop.xlane.xlu1 %286 }
  0xa0   :  { %v291_v33 = vadd.f32 %v287_v42, %v275_v52 }
  0xa2   :  { %295 = vst.msk [vmem:[%s789_s3 + $0x18] sm:$0xff] %vm48_vm10, %v291_v33 }
  0xa3   :  { %v284_v53 = vpop.xlane.xlu0 %283 }
  0xa4   :  { %v290_v54 = vadd.f32 %v284_v53, %v274_v34 }
  0xa6   :  { %294 = vst.msk [vmem:[%s789_s3 + $0x10] sm:$0xff] %vm48_vm10, %v290_v54  ;;  %v278_v57 = vpop.xlane.xlu2 %277 }
  0xa7   :  { %v259_v56 = vpop.xlane.xlu1 %258  ;;  %v288_v59 = vadd.f32 %v278_v57, %v272_v55 }
  0xa8   :  { %v265_v58 = vadd.f32 %v259_v56, %v241_v45 }
  0xa9   :  { %292 = vst.msk [vmem:[%s789_s3] sm:$0xff] %vm48_vm10, %v288_v59 }
  0xaa   :  { %270 = vst.msk [vmem:[%s788_s2 + $0x10] sm:$0xff] %vm48_vm10, %v265_v58 }
  0xab   :  { %v253_v61 = vpop.xlane.xlu0 %252 }
  0xac   :  { %v263_v62 = vadd.f32 %v253_v61, %v239_v60 }
  0xae   :  { %268 = vst.msk [vmem:[%s788_s2] sm:$0xff] %vm48_vm10, %v263_v62 }
  0xaf   :  { %v262_v2 = vpop.xlane.xlu1 %261 }
  0xb0   :  { %v266_v3 = vadd.f32 %v262_v2, %v242_v63 }
  0xb1   :  { %v281_v5 = vpop.xlane.xlu2 %280 }
  0xb2   :  { %271 = vst.msk [vmem:[%s788_s2 + $0x18] sm:$0xff] %vm48_vm10, %v266_v3  ;;  %v289_v50 = vadd.f32 %v281_v5, %v273_v4 }
  0xb3   :  { %v256_v8 = vpop.xlane.xlu0 %255 }
  0xb4   :  { %293 = vst.msk [vmem:[%s789_s3 + $0x8] sm:$0xff] %vm48_vm10, %v289_v50  ;;  %v264_v10 = vadd.f32 %v256_v8, %v240_v6 }
  0xb6   :  { %269 = vst.msk [vmem:[%s788_s2 + $0x8] sm:$0xff] %vm48_vm10, %v264_v10 }
  0xb7   :  { %v308_v9 = vpop.xlane.xlu1 %307 }
  0xb8   :  { %v314_v11 = vadd.f32 %v308_v9, %v298_v7 }
  0xb9   :  { %v311_v15 = vpop.xlane.xlu2 %310 }
  0xba   :  { %318 = vst.msk [vmem:[%s790_s4 + $0x10] sm:$0xff] %vm48_vm10, %v314_v11  ;;  %v315_v16 = vadd.f32 %v311_v15, %v299_v14 }
  0xbb   :  { %v305_v17 = vpop.xlane.xlu0 %304 }
  0xbc   :  { %319 = vst.msk [vmem:[%s790_s4 + $0x18] sm:$0xff] %vm48_vm10, %v315_v16  ;;  %v313_v18 = vadd.f32 %v305_v17, %v297_v12 }
  0xbe   :  { %317 = vst.msk [vmem:[%s790_s4 + $0x8] sm:$0xff] %vm48_vm10, %v313_v18 }
  0xbf   :  { %332 = vsyncpa [#allocation3], 1 }
  0xc0   :  { %333 = vsyncpa [#allocation5], 1 }

</bundles_post_ra>
